<compile_context>
chip_gen: v6e
topology: v6e:2x2x1
jax: 0.10.0
libtpu: 0.0.40
codegen_flags: <defaults>
</compile_context>

<pallas_src>
import numpy as np
import jax
import jax.numpy as jnp
from jax.experimental import pallas as pl
from jax.experimental.pallas import tpu as pltpu

_INV16 = 1.0 / 16.0  # ([1,2,1] x [1,2,1]) / 16 == [[1,2,1],[2,4,2],[1,2,1]] / 16


def _blur_kernel(x_ref, o_ref):
    # x_ref / o_ref: (P, H, W) block of independent planes.
    x = x_ref[...].astype(jnp.float32)
    _, H, W = x.shape

    # Vertical [1, 2, 1] pass with replicate edges.  Neighbors are built as
    # height-H concatenations (edge row + shifted view) — no (H+2) slab.
    up = jnp.concatenate([x[:, :1, :], x[:, : H - 1, :]], axis=1)     # x[r-1], replicate at r=0
    down = jnp.concatenate([x[:, 1:, :], x[:, H - 1 :, :]], axis=1)   # x[r+1], replicate at r=H-1
    v = (up + down) + x + x                                           # [1,2,1] * x  (weights folded later)

    # Horizontal [1, 2, 1] pass with replicate edges, same width-preserving
    # trick along the lane axis — no (W+2) slab, last dim stays W.
    left = jnp.concatenate([v[:, :, :1], v[:, :, : W - 1]], axis=2)   # v[c-1], replicate at c=0
    right = jnp.concatenate([v[:, :, 1:], v[:, :, W - 1 :]], axis=2)  # v[c+1], replicate at c=W-1
    h = (left + right) + v + v

    # Single multiply folds all separable weights (1/16).
    o_ref[...] = (h * jnp.float32(_INV16)).astype(o_ref.dtype)


def _choose_p(planes, H, W):
    """Planes per block: ~1.5 MiB of f32 per buffer, grid kept >= 2 steps."""
    target_bytes = 3 * 512 * 1024          # ~1.5 MiB f32 per live buffer
    per_plane = H * W * 4
    p = max(1, target_bytes // per_plane)
    p = min(p, planes)
    # Keep at least 2 grid steps (when possible) so the "parallel" axis can
    # actually shard across v7x's two TensorCores.
    if planes >= 2 and p >= planes:
        p = (planes + 1) // 2
    return int(p)


def blur(x):
    """x: (N, C, H, W) -> (N, C, H, W); replicate-padded 3x3 binomial blur per channel."""
    N, C, H, W = x.shape
    planes = N * C
    xp = x.reshape(planes, H, W)

    P = _choose_p(planes, H, W)
    G = pl.cdiv(planes, P)
    padded = G * P
    if padded != planes:
        # Pad with zero planes; they are blurred independently and sliced off.
        xp = jnp.pad(xp, ((0, padded - planes), (0, 0), (0, 0)))

    out = pl.pallas_call(
        _blur_kernel,
        out_shape=jax.ShapeDtypeStruct((padded, H, W), x.dtype),
        grid_spec=pltpu.PrefetchScalarGridSpec(
            num_scalar_prefetch=0,
            grid=(G,),
            in_specs=[pl.BlockSpec((P, H, W), lambda i: (i, 0, 0))],
            out_specs=pl.BlockSpec((P, H, W), lambda i: (i, 0, 0)),
        ),
        compiler_params=pltpu.CompilerParams(
            dimension_semantics=("parallel",),
            vmem_limit_bytes=32 * 1024 * 1024,  # headroom above v5e's 16 MiB scoped default
        ),
    )(xp)

    if padded != planes:
        out = out[:planes]
    return out.reshape(N, C, H, W)


def _blur_ref(x):
    # Pure-JAX reference: replicate pad + 3x3 binomial weighted sum.
    w = np.array([[1.0, 2.0, 1.0], [2.0, 4.0, 2.0], [1.0, 2.0, 1.0]], dtype=np.float32)
    w = w / w.sum()
    N, C, H, W = x.shape
    xp = jnp.pad(x, ((0, 0), (0, 0), (1, 1), (1, 1)), mode="edge").astype(jnp.float32)
    acc = jnp.zeros((N, C, H, W), jnp.float32)
    for di in range(3):
        for dj in range(3):
            acc = acc + float(w[di, dj]) * xp[:, :, di : di + H, dj : dj + W]
    return acc.astype(x.dtype)


if __name__ == "__main__":
    key = jax.random.PRNGKey(0)
    x = jax.random.normal(key, (2, 4, 16, 16), dtype=jnp.float32)

    y = blur(x)
    jax.block_until_ready(y)

    y_ref = _blur_ref(x)
    np.testing.assert_allclose(np.asarray(y), np.asarray(y_ref), rtol=1e-5, atol=1e-5)

    print("KERNEL_OK")
</pallas_src>

<mosaic_0001>
module attributes {stable_mosaic.version = 11 : i64} {
  func.func @_blur_kernel(%arg0: i32, %arg1: memref<4x16x16xf32, #tpu.memory_space<vmem>>, %arg2: memref<4x16x16xf32, #tpu.memory_space<vmem>>) attributes {dimension_semantics = [#tpu.dimension_semantics<parallel>], iteration_bounds = array<i64: 2>, scalar_prefetch = 0 : i64, scratch_operands = 0 : i64, tpu.core_type = #tpu.core_type<tc>, window_params = [{transform_indices = @transform_0, window_bounds = array<i64: 4, 16, 16>}, {transform_indices = @transform_1, window_bounds = array<i64: 4, 16, 16>}]} {
    %c0 = arith.constant 0 : index
    %c0_0 = arith.constant 0 : index
    %c0_1 = arith.constant 0 : index
    %0 = vector.load %arg1[%c0, %c0_0, %c0_1] : memref<4x16x16xf32, #tpu.memory_space<vmem>>, vector<4x16x16xf32>
    %1 = vector.extract_strided_slice %0 {offsets = [0, 0, 0], sizes = [4, 1, 16], strides = [1, 1, 1]} : vector<4x16x16xf32> to vector<4x1x16xf32>
    %2 = vector.extract_strided_slice %0 {offsets = [0, 0, 0], sizes = [4, 15, 16], strides = [1, 1, 1]} : vector<4x16x16xf32> to vector<4x15x16xf32>
    %3 = tpu.concatenate %1, %2 in 1 : vector<4x1x16xf32>, vector<4x15x16xf32> -> vector<4x16x16xf32>
    %4 = vector.extract_strided_slice %0 {offsets = [0, 1, 0], sizes = [4, 15, 16], strides = [1, 1, 1]} : vector<4x16x16xf32> to vector<4x15x16xf32>
    %5 = vector.extract_strided_slice %0 {offsets = [0, 15, 0], sizes = [4, 1, 16], strides = [1, 1, 1]} : vector<4x16x16xf32> to vector<4x1x16xf32>
    %6 = tpu.concatenate %4, %5 in 1 : vector<4x15x16xf32>, vector<4x1x16xf32> -> vector<4x16x16xf32>
    %7 = arith.addf %3, %6 : vector<4x16x16xf32>
    %8 = arith.addf %7, %0 : vector<4x16x16xf32>
    %9 = arith.addf %8, %0 : vector<4x16x16xf32>
    %10 = vector.extract_strided_slice %9 {offsets = [0, 0, 0], sizes = [4, 16, 1], strides = [1, 1, 1]} : vector<4x16x16xf32> to vector<4x16x1xf32>
    %11 = vector.extract_strided_slice %9 {offsets = [0, 0, 0], sizes = [4, 16, 15], strides = [1, 1, 1]} : vector<4x16x16xf32> to vector<4x16x15xf32>
    %12 = tpu.concatenate %10, %11 in 2 : vector<4x16x1xf32>, vector<4x16x15xf32> -> vector<4x16x16xf32>
    %13 = vector.extract_strided_slice %9 {offsets = [0, 0, 1], sizes = [4, 16, 15], strides = [1, 1, 1]} : vector<4x16x16xf32> to vector<4x16x15xf32>
    %14 = vector.extract_strided_slice %9 {offsets = [0, 0, 15], sizes = [4, 16, 1], strides = [1, 1, 1]} : vector<4x16x16xf32> to vector<4x16x1xf32>
    %15 = tpu.concatenate %13, %14 in 2 : vector<4x16x15xf32>, vector<4x16x1xf32> -> vector<4x16x16xf32>
    %16 = arith.addf %12, %15 : vector<4x16x16xf32>
    %17 = arith.addf %16, %9 : vector<4x16x16xf32>
    %18 = arith.addf %17, %9 : vector<4x16x16xf32>
    %cst = arith.constant 6.250000e-02 : f32
    %19 = vector.broadcast %cst : f32 to vector<4x16x16xf32>
    %20 = arith.mulf %18, %19 : vector<4x16x16xf32>
    %c0_2 = arith.constant 0 : index
    %c0_3 = arith.constant 0 : index
    %c0_4 = arith.constant 0 : index
    %21 = vector.load %arg2[%c0_2, %c0_3, %c0_4] : memref<4x16x16xf32, #tpu.memory_space<vmem>>, vector<4x16x16xf32>
    tpu.vector_store %arg2[%c0_2, %c0_3, %c0_4], %20 {strides = array<i32>} : memref<4x16x16xf32, #tpu.memory_space<vmem>>, vector<4x16x16xf32>,
    return
  }
  func.func @transform_0(%arg0: i32) -> (i32, i32, i32) {
    %c0_i32 = arith.constant 0 : i32
    %c0_i32_0 = arith.constant 0 : i32
    %c0_i32_1 = arith.constant 0 : i32
    return %arg0, %c0_i32, %c0_i32_0 : i32, i32, i32
  }
  func.func @transform_1(%arg0: i32) -> (i32, i32, i32) {
    %c0_i32 = arith.constant 0 : i32
    %c0_i32_0 = arith.constant 0 : i32
    %c0_i32_1 = arith.constant 0 : i32
    return %arg0, %c0_i32, %c0_i32_0 : i32, i32, i32
  }
}

</mosaic_0001>

<bundles_post_ra>
// kernel: tpu_custom_call.1
= control target key start
LH: loop header
LB: loop body
LE: loop exit
PB: predicated region body
PF: predicated region fallthrough
CT: control target
= control target key end

     0   :  { %6 = vsyncpa [#allocation3], 0  ;;  %s890_s0 = inlined_call_operand.hbm [shape: f32[8,16,16], index: 0, kind: input, shape index: {}]   ;;  %s891_s1 = inlined_call_operand.hbm [shape: f32[8,16,16], index: 1, kind: output, shape index: {}]  }
   0x1   :  { %8 = vsyncpa [#allocation3 + $0x1], 0 }
   0x2   :  { %9 = vsyncpa [#allocation4], 0 }
   0x3   :  { %11 = vsyncpa [#allocation4 + $0x1], 0  ;;  %s615_s6 = smov 0   ;;  %s617_s7 = smov 0  }
   0x4   :  { %s619_s8 = smov 0   ;;  %s621_s9 = smov 0  }
   0x5 LB: > { %s636_s10 = sadd.s32 4294967295, %s595_s9   ;;  %s431_s11 = sadd.s32 4294967294, %s595_s9   ;;  %s595_s9 = sphi %s621_s9, %s906_s9   ;;  %s591_s8 = sphi %s619_s8, %s905_s8   ;;  %s587_s7 = sphi %s617_s7, %s904_s7   ;;  %s583_s6 = sphi %s615_s6, %s903_s6  }
   0x6   : > { %s640_s12 = sadd.s32 1, %s595_s9   ;;  %s24_s13 = sadd.s32 1, %s591_s8 }
   0x7   : > { %s21_s14 = ssub.s32 %s595_s9, %s640_s12  ;;  %p31_p0 = scmp.ne.s32.totalorder %s591_s8, %s587_s7 }
   0x8   : > { %p22_p1 = scmp.eq.s32.totalorder %s21_s14, 0  ;;  %p32_p2 = scmp.eq.s32.totalorder %s595_s9, 0 }
   0x9   : > { %p37_p3 = scmp.ne.s32.totalorder %s587_s7, %s583_s6  ;;  %p38_p4 = scmp.eq.s32.totalorder %s636_s10, 0 }
   0xa   : > { %s652_s15 = scalar_select %p22_p1, %s591_s8, %s24_s13  }
   0xb   : > { %p654_p5 = por %p32_p2, %p31_p0  ;;  %p658_p6 = por %p38_p4, %p37_p3 }
   0xc   : > { %p61_p7 = scmp.eq.s32.totalorder %s636_s10, 1  ;;  %p67_p8 = scmp.eq.s32.totalorder %s431_s11, 1 }
   0xd   : > { %s895_s17 = scalar_select %p658_p6, 1, 0 }
   0xe   : > { %p463_p10 = scmp.lt.s32.totalorder %s595_s9, 2  ;;  %p665_p11 = por %p61_p7, %p31_p0 }
   0xf   : > { %p669_p12 = por %p67_p8, %p37_p3  ;;  %s87_s20 = sand.u32 1, %s591_s8  }
  0x10   : > { %s896_s18 = scalar_select %p665_p11, 1, 0 }
  0x11   : > { %s897_s19 = scalar_select %p669_p12, 1, 0 }
  0x12   : > { %s448_s21 = sshll.u32 %s595_s9, 10  ;;  %s434_s22 = sshll.u32 %s87_s20, 6 }
  0x13   : > { %s678_s25 = scalar_lea.hbm %s890_s0, %s448_s21  ;;  %s91_s26 = scalar_lea.vmem [#allocation2], %s434_s22 }
  0x14   : > { %s99_s27 = sshll.u32 %s91_s26, 4  ;;  %p682_p13 = pnand %p463_p10, %p654_p5  ;;  %s686_s27 = int_to_ptr.vmem [resolvable:$true] %s99_s27 }
  0x15   : > { %s688_s29 = scalar_lea.sflag [#allocation3], %s87_s20  ;;  %s503_s30 = scalar_lea.hbm %s678_s25, 1024 }
  0x16   : > { %p504_p0 = scmp.ne.s32.totalorder %s678_s25, %s503_s30  ;;  %p505_p1 = pneg %p682_p13 }
  0x17   : > { %s508_s4 = scalar_lea.hbm %s890_s0, 2048  ;;  %p509_p4 = scmp.lt.s32.totalorder %s678_s25, %s890_s0 }
  0x18   : > { %p506_p2 = pnand %p505_p1, %p504_p0  ;;  %p510_p5 = scmp.lt.s32.totalorder %s508_s4, %s503_s30 }
  0x1a   : > { %p507_p3 = pneg %p506_p2  ;;  %p511_p7 = por %p510_p5, %p509_p4 }
  0x1c   : > { %p512_p8 = pnand %p511_p7, %p507_p3 }
  0x1e   : > { %515 = shalt.err (!%p512_p8)
}
  0x1f   : > { %s516_s13 = scalar_lea.vmem %s686_s27, 1024  ;;  %s597_s14 = smov [#allocation2]  }
  0x20   : > { %p517_p10 = scmp.ne.s32.totalorder %s686_s27, %s516_s13  ;;  %s521_s16 = sshll.u32 %s597_s14, 4  ;;  %s522_s16 = int_to_ptr.vmem [resolvable:$false] %s521_s16 }
  0x21   : > { %s523_s20 = scalar_lea.vmem %s522_s16, 2048  ;;  %p524_p2 = scmp.lt.s32.totalorder %s686_s27, %s522_s16 }
  0x22   : > { %p519_p9 = pnand %p517_p10, %p505_p1  ;;  %p525_p12 = scmp.lt.s32.totalorder %s523_s20, %s516_s13 }
  0x24   : > { %p520_p0 = pneg %p519_p9  ;;  %p526_p11 = por %p525_p12, %p524_p2 }
  0x26   : > { %p527_p6 = pnand %p526_p11, %p520_p0 }
  0x28   : > { %530 = shalt.err (!%p527_p6)
}
  0x29   : > { %s598_s21 = smov 128   ;;  %s599_s22 = smov 8  }
  0x2a   : > { %458 = dma.hbm_to_vmem [thread:$0]  (!%p682_p13), %s678_s25, 1024, %s686_s27, %s688_s29, %s598_s21, %s598_s21, %s599_s22  }
  0x2b   : > { %p438_p9 = scmp.ge.s32.totalorder %s595_s9, 1  ;;  %p107_p1 = scmp.lt.s32.totalorder %s595_s9, 3 }
  0x2d   : > { %p108_p3 = pnand %p438_p9, %p107_p1 }
  0x2e   : > { %s712_s23 = sand.u32 (!%p108_p3), 1, %s587_s7   ;;  %p899_p6 = scmp.ne.s32.totalorder (!%p108_p3), %s895_s17, 0 }
  0x2f   : > { %111 = sbr.rel (%p108_p3) target bundleno = 230 (0xe6), region = 24  ;;  %s439_s24 = sshll.u32 (!%p108_p3), %s712_s23, 6 }
  0x30   : > { %s114_s26 = scalar_lea.sflag (!%p108_p3), [#allocation3], %s712_s23  ;;  %s718_s30 = scalar_lea.vmem (!%p108_p3), [#allocation2], %s439_s24 }
  0x34   : > { %574 = dma.done.wait (%p899_p6), %s114_s26, 1024  }
  0x35   : > { %576 = vsyncadd (%p899_p6), %s114_s26, 4294966272  ;;  %v140_v0 = vld [vmem:[%s718_s30 + $0x10] sm:$0xff]  ;;  %v141_v1 = vld [vmem:[%s718_s30 + $0x18] sm:$0xff]  ;;  %vm154_vm0 = vcmask 1040384   ;;  %vm179_vm1 = vcmask 1046528   ;;  %s600_s17 = smov 1  }
  0x36   : > { %v138_v2 = vld [vmem:[%s718_s30] sm:$0xff]  ;;  %v158_v3 = vrot.slane %v140_v0, 7  ;;  %v183_v4 = vrot.slane %v140_v0, 1  ;;  %v184_v5 = vrot.slane %v141_v1, 1  ;;  %v139_v6 = vld [vmem:[%s718_s30 + $0x8] sm:$0xff]  ;;  %v159_v10 = vrot.slane %v141_v1, 7 }
  0x37   : > { %v155_v7 = vrot.slane %v138_v2, 7  ;;  %v180_v8 = vrot.slane %v138_v2, 1  ;;  %v181_v9 = vrot.slane %v139_v6, 1  ;;  %v156_v11 = vrot.slane %v139_v6, 7  ;;  %v142_v12 = vld [vmem:[%s718_s30 + $0x20] sm:$0xff]  ;;  %v143_v17 = vld [vmem:[%s718_s30 + $0x28] sm:$0xff] }
  0x38   : > { %v176_v13 = vsel %vm154_vm0, %v140_v0, %v158_v3  ;;  %v185_v14 = vsel %vm179_vm1, %v183_v4, %v184_v5  ;;  %v201_v16 = vsel %vm179_vm1, %v184_v5, %v141_v1  ;;  %v160_v20 = vsel %vm154_vm0, %v158_v3, %v159_v10  ;;  %v144_v34 = vld [vmem:[%s718_s30 + $0x30] sm:$0xff]  ;;  %v145_v35 = vld [vmem:[%s718_s30 + $0x38] sm:$0xff]  ;;  %s601_s25 = smov 127   ;;  %s802_s27 = scalar_lea.vmem [#allocation5], %s439_s24 }
  0x39   : > { %v175_v15 = vsel %vm154_vm0, %v138_v2, %v155_v7  ;;  %v206_v18 = vadd.f32 %v185_v14, %v176_v13  ;;  %v182_v19 = vsel %vm179_vm1, %v180_v8, %v181_v9  ;;  %v157_v21 = vsel %vm154_vm0, %v155_v7, %v156_v11  ;;  %s450_s28 = sshll.u32 %s636_s10, 10  ;;  %s358_s29 = sshll.u32 %s802_s27, 4  ;;  %s843_s29 = int_to_ptr.vmem [resolvable:$true] %s358_s29 }
  0x3a   : > { %v204_v22 = vadd.f32 %v182_v19, %v175_v15  ;;  %v207_v23 = vadd.f32 %v201_v16, %v160_v20  ;;  %v200_v24 = vsel %vm179_vm1, %v181_v9, %v139_v6  ;;  %v161_v25 = vrot.slane %v142_v12, 7  ;;  %s841_s4 = scalar_lea.hbm %s891_s1, %s450_s28  ;;  %s344_s10 = scalar_lea.sflag [#allocation4], %s712_s23 }
  0x3b   : > { %v214_v26 = vadd.f32 %v206_v18, %v140_v0  ;;  %v205_v27 = vadd.f32 %v200_v24, %v157_v21  ;;  %v162_v28 = vrot.slane %v143_v17, 7  ;;  %v187_v29 = vrot.slane %v143_v17, 1  ;;  %s531_s5 = scalar_lea.vmem %s843_s29, 1024  ;;  %p900_p12 = scmp.ne.s32.totalorder %s896_s18, 0 }
  0x3c   : > { %v212_v30 = vadd.f32 %v204_v22, %v138_v2  ;;  %v215_v31 = vadd.f32 %v207_v23, %v141_v1  ;;  %v177_v32 = vsel %vm154_vm0, %v142_v12, %v161_v25  ;;  %v186_v33 = vrot.slane %v142_v12, 1  ;;  %p532_p11 = scmp.ne.s32.totalorder %s843_s29, %s531_s5  ;;  %s602_s11 = smov [#allocation5]  }
  0x3d   : > { %v741_v36 = vadd.f32 %v214_v26, %v140_v0  ;;  %v213_v37 = vadd.f32 %v205_v27, %v139_v6  ;;  %v163_v38 = vsel %vm154_vm0, %v161_v25, %v162_v28  ;;  %v202_v39 = vsel %vm179_vm1, %v187_v29, %v143_v17  ;;  %s535_s13 = sshll.u32 %s602_s11, 4  ;;  %s536_s13 = int_to_ptr.vmem [resolvable:$false] %s535_s13 }
  0x3e   : > { %v745_v40 = vadd.f32 %v212_v30, %v138_v2  ;;  %v209_v41 = vadd.f32 %v202_v39, %v163_v38  ;;  %v188_v42 = vsel %vm179_vm1, %v186_v33, %v187_v29  ;;  %v749_v43 = vadd.f32 %v215_v31, %v141_v1  ;;  %p533_p13 = pnand %p532_p11, %p900_p12  ;;  %s537_s14 = scalar_lea.vmem %s536_s13, 2048 }
  0x3f   : > { %240 = vrot.lane.b32.xlu1 %v741_v36, %s600_s17  ;;  %v208_v44 = vadd.f32 %v188_v42, %v177_v32  ;;  %v164_v45 = vrot.slane %v144_v34, 7  ;;  %v165_v46 = vrot.slane %v145_v35, 7  ;;  %v221_v47 = vadd.f32 %v213_v37, %v139_v6  ;;  %p538_p5 = scmp.lt.s32.totalorder %s843_s29, %s536_s13  ;;  %p539_p7 = scmp.lt.s32.totalorder %s537_s14, %s531_s5 }
  0x40   : > { %236 = vrot.lane.b32.xlu0 %v745_v40, %s600_s17  ;;  %v217_v48 = vadd.f32 %v209_v41, %v143_v17  ;;  %v190_v49 = vrot.slane %v145_v35, 1  ;;  %v189_v50 = vrot.slane %v144_v34, 1  ;;  %vm293_vm2 = vcmask 121856   ;;  %p534_p4 = pneg %p533_p13 }
  0x41   : > { %v216_v51 = vadd.f32 %v208_v44, %v142_v12  ;;  %v166_v52 = vsel %vm154_vm0, %v164_v45, %v165_v46  ;;  %v178_v53 = vsel %vm154_vm0, %v144_v34, %v164_v45  ;;  %vm260_vm3 = vcmask 7168   ;;  %p540_p8 = por %p539_p7, %p538_p5 }
  0x42   : > { %v203_v54 = vsel %vm179_vm1, %v190_v49, %v145_v35  ;;  %v191_v55 = vsel %vm179_vm1, %v189_v50, %v190_v49  ;;  %v757_v56 = vadd.f32 %v217_v48, %v143_v17  ;;  %vm334_vm4 = vcmask 130048  }
  0x43   : > { %242 = vrot.lane.b32.xlu1 %v749_v43, %s600_s17  ;;  %v211_v57 = vadd.f32 %v203_v54, %v166_v52  ;;  %v210_v58 = vadd.f32 %v191_v55, %v178_v53  ;;  %v759_v59 = vadd.f32 %v216_v51, %v142_v12  ;;  %p541_p10 = pnand %p540_p8, %p534_p4 }
  0x44   : > { %238 = vrot.lane.b32.xlu0 %v221_v47, %s600_s17 }
  0x45   : > { %v219_v60 = vadd.f32 %v211_v57, %v145_v35  ;;  %v218_v61 = vadd.f32 %v210_v58, %v144_v34 }
  0x47   : > { %246 = vrot.lane.b32.xlu1 %v757_v56, %s600_s17  ;;  %v762_v62 = vadd.f32 %v219_v60, %v145_v35  ;;  %v765_v63 = vadd.f32 %v218_v61, %v144_v34 }
  0x48   : > { %244 = vrot.lane.b32.xlu0 %v759_v59, %s600_s17 }
  0x4b   : > { %250 = vrot.lane.b32.xlu1 %v762_v62, %s600_s17 }
  0x4c   : > { %248 = vrot.lane.b32.xlu0 %v765_v63, %s600_s17 }
  0x4f   : > { %271 = vrot.lane.b32.xlu1 %v221_v47, %s601_s25 }
  0x50   : > { %269 = vrot.lane.b32.xlu0 %v745_v40, %s601_s25 }
  0x53   : > { %275 = vrot.lane.b32.xlu1 %v749_v43, %s601_s25 }
  0x54   : > { %273 = vrot.lane.b32.xlu0 %v741_v36, %s601_s25 }
  0x57   : > { %279 = vrot.lane.b32.xlu1 %v757_v56, %s601_s25 }
  0x58   : > { %277 = vrot.lane.b32.xlu0 %v759_v59, %s601_s25 }
  0x5b   : > { %283 = vrot.lane.b32.xlu1 %v762_v62, %s601_s25 }
  0x5c   : > { %281 = vrot.lane.b32.xlu0 %v765_v63, %s601_s25 }
  0xb1   : > { %v241_v0 = vpop.permute.xlu1 %240 }
  0xb2   : > { %v237_v1 = vpop.permute.xlu0 %236  ;;  %v263_v22 = vsel %vm260_vm3, %v741_v36, %v241_v0 }
  0xb3   : > { %v261_v12 = vsel %vm260_vm3, %v745_v40, %v237_v1 }
  0xb5   : > { %v243_v2 = vpop.permute.xlu1 %242 }
  0xb6   : > { %v239_v3 = vpop.permute.xlu0 %238  ;;  %v264_v18 = vsel %vm260_vm3, %v749_v43, %v243_v2 }
  0xb7   : > { %v262_v9 = vsel %vm260_vm3, %v221_v47, %v239_v3 }
  0xb9   : > { %v247_v4 = vpop.permute.xlu1 %246 }
  0xba   : > { %v245_v5 = vpop.permute.xlu0 %244  ;;  %v266_v31 = vsel %vm260_vm3, %v757_v56, %v247_v4 }
  0xbb   : > { %v265_v37 = vsel %vm260_vm3, %v759_v59, %v245_v5 }
  0xbd   : > { %v251_v6 = vpop.permute.xlu1 %250 }
  0xbe   : > { %v249_v7 = vpop.permute.xlu0 %248 }
  0xc1   : > { %v272_v8 = vpop.permute.xlu1 %271 }
  0xc2   : > { %v295_v10 = vsel %vm293_vm2, %v272_v8, %v221_v47  ;;  %v270_v11 = vpop.permute.xlu0 %269 }
  0xc3   : > { %v303_v13 = vadd.f32 %v295_v10, %v262_v9  ;;  %v294_v14 = vsel %vm293_vm2, %v270_v11, %v745_v40 }
  0xc4   : > { %v302_v15 = vadd.f32 %v294_v14, %v261_v12 }
  0xc5   : > { %v311_v16 = vadd.f32 %v303_v13, %v221_v47  ;;  %v276_v17 = vpop.permute.xlu1 %275 }
  0xc6   : > { %v310_v19 = vadd.f32 %v302_v15, %v745_v40  ;;  %v297_v20 = vsel %vm293_vm2, %v276_v17, %v749_v43  ;;  %v274_v21 = vpop.permute.xlu0 %273 }
  0xc7   : > { %v319_v23 = vadd.f32 %v311_v16, %v221_v47  ;;  %v305_v24 = vadd.f32 %v297_v20, %v264_v18  ;;  %v296_v25 = vsel %vm293_vm2, %v274_v21, %v741_v36  ;;  %v268_v47 = vsel %vm260_vm3, %v762_v62, %v251_v6 }
  0xc8   : > { %v318_v26 = vadd.f32 %v310_v19, %v745_v40  ;;  %v304_v27 = vadd.f32 %v296_v25, %v263_v22 }
  0xc9   : > { %v327_v28 = vmul.f32 0.0625, %v319_v23  ;;  %v313_v29 = vadd.f32 %v305_v24, %v749_v43  ;;  %v280_v30 = vpop.permute.xlu1 %279 }
  0xca   : > { %v326_v32 = vmul.f32 0.0625, %v318_v26  ;;  %v312_v33 = vadd.f32 %v304_v27, %v741_v36  ;;  %v299_v34 = vsel %vm293_vm2, %v280_v30, %v757_v56  ;;  %v278_v35 = vpop.permute.xlu0 %277 }
  0xcb   : > { %336 = vst.msk [vmem:[%s802_s27 + $0x8] sm:$0xff] %vm334_vm4, %v327_v28  ;;  %v321_v38 = vadd.f32 %v313_v29, %v749_v43  ;;  %v307_v39 = vadd.f32 %v299_v34, %v266_v31  ;;  %v298_v40 = vsel %vm293_vm2, %v278_v35, %v759_v59 }
  0xcc   : > { %335 = vst.msk [vmem:[%s802_s27] sm:$0xff] %vm334_vm4, %v326_v32  ;;  %v320_v41 = vadd.f32 %v312_v33, %v741_v36  ;;  %v306_v42 = vadd.f32 %v298_v40, %v265_v37  ;;  %v267_v36 = vsel %vm260_vm3, %v765_v63, %v249_v7 }
  0xcd   : > { %v329_v44 = vmul.f32 0.0625, %v321_v38  ;;  %v315_v45 = vadd.f32 %v307_v39, %v757_v56  ;;  %v284_v46 = vpop.permute.xlu1 %283 }
  0xce   : > { %v328_v48 = vmul.f32 0.0625, %v320_v41  ;;  %v314_v43 = vadd.f32 %v306_v42, %v759_v59  ;;  %v301_v49 = vsel %vm293_vm2, %v284_v46, %v762_v62  ;;  %v282_v50 = vpop.permute.xlu0 %281 }
  0xcf   : > { %338 = vst.msk [vmem:[%s802_s27 + $0x18] sm:$0xff] %vm334_vm4, %v329_v44  ;;  %v323_v51 = vadd.f32 %v315_v45, %v757_v56  ;;  %v309_v52 = vadd.f32 %v301_v49, %v268_v47  ;;  %v300_v53 = vsel %vm293_vm2, %v282_v50, %v765_v63 }
  0xd0   : > { %337 = vst.msk [vmem:[%s802_s27 + $0x10] sm:$0xff] %vm334_vm4, %v328_v48  ;;  %v322_v54 = vadd.f32 %v314_v43, %v759_v59  ;;  %v308_v55 = vadd.f32 %v300_v53, %v267_v36 }
  0xd1   : > { %v331_v57 = vmul.f32 0.0625, %v323_v51  ;;  %v317_v58 = vadd.f32 %v309_v52, %v762_v62 }
  0xd2   : > { %v330_v60 = vmul.f32 0.0625, %v322_v54  ;;  %v316_v61 = vadd.f32 %v308_v55, %v765_v63 }
  0xd3   : > { %340 = vst.msk [vmem:[%s802_s27 + $0x28] sm:$0xff] %vm334_vm4, %v331_v57  ;;  %v325_v56 = vadd.f32 %v317_v58, %v762_v62 }
  0xd4   : > { %339 = vst.msk [vmem:[%s802_s27 + $0x20] sm:$0xff] %vm334_vm4, %v330_v60  ;;  %v324_v59 = vadd.f32 %v316_v61, %v765_v63 }
  0xd5   : > { %v333_v0 = vmul.f32 0.0625, %v325_v56 }
  0xd6   : > { %v332_v1 = vmul.f32 0.0625, %v324_v59 }
  0xd7   : > { %342 = vst.msk [vmem:[%s802_s27 + $0x38] sm:$0xff] %vm334_vm4, %v333_v0 }
  0xd8   : > { %341 = vst.msk [vmem:[%s802_s27 + $0x30] sm:$0xff] %vm334_vm4, %v332_v1 }
  0xd9   : > { %544 = shalt.err (!%p541_p10)
}
  0xda   : > { %s545_s16 = scalar_lea.hbm %s841_s4, 1024  ;;  %s549_s22 = scalar_lea.hbm %s891_s1, 2048 }
  0xdb   : > { %p546_p0 = scmp.ne.s32.totalorder %s841_s4, %s545_s16  ;;  %p550_p1 = scmp.lt.s32.totalorder %s841_s4, %s891_s1 }
  0xdc   : > { %p551_p3 = scmp.lt.s32.totalorder %s549_s22, %s545_s16 }
  0xdd   : > { %p547_p2 = pnand %p546_p0, %p900_p12 }
  0xde   : > { %p552_p6 = por %p551_p3, %p550_p1 }
  0xdf   : > { %p548_p9 = pneg %p547_p2 }
  0xe1   : > { %p553_p11 = pnand %p552_p6, %p548_p9 }
  0xe3   : > { %556 = shalt.err (!%p553_p11)
}
  0xe4   : > { %s603_s30 = smov 128   ;;  %s604_s17 = smov 8  }
  0xe5   : > { %453 = dma.vmem_to_hbm [thread:$0]  (%p900_p12), %s843_s29, 1024, %s841_s4, %s344_s10, %s603_s30, %s603_s30, %s604_s17  }
  0xe6 PF: > { %s373_s25 = sand.u32 1, %s583_s6   ;;  %p901_p13 = scmp.ne.s32.totalorder %s897_s19, 0 }
  0xe7   : > { %p902_p4 = scmp.ge.s32.totalorder %s595_s9, 2  ;;  %s374_s27 = scalar_lea.sflag [#allocation4], %s373_s25 }
  0xe9   : > { %p460_p5 = pnand %p902_p4, %p901_p13 }
  0xeb   : > { %p461_p7 = pneg %p460_p5 }
  0xed   : > { %578 = dma.done.wait (%p461_p7), %s374_s27, 1024  }
  0xee   : > { %580 = vsyncadd (%p461_p7), %s374_s27, 4294966272  ;;  %p14_p8 = scmp.ge.s32.totalorder %s640_s12, 4   ;;  %s903_s6 = smov %s587_s7 }
  0xef   : > { %s904_s7 = smov %s591_s8  ;;  %s905_s8 = smov %s652_s15 }
  0xf0   : > { %s906_s9 = smov %s640_s12  ;;  %16 = sbr.rel (!%p14_p8) target bundleno = 5 (0x5), region = 69 }
  0xf5   :  { %379 = vsyncpa [#allocation3], 1 }
  0xf6   :  { %381 = vsyncpa [#allocation3 + $0x1], 1 }
  0xf7   :  { %382 = vsyncpa [#allocation4], 1 }
  0xf8   :  { %384 = vsyncpa [#allocation4 + $0x1], 1 }

</bundles_post_ra>
